<compile_context>
chip_gen: v5e
topology: v5e:2x2
jax: 0.10.0
libtpu: 0.0.40
codegen_flags: <defaults>
</compile_context>

<pallas_src>
import jax
import jax.numpy as jnp
from jax.experimental import pallas as pl
from jax.experimental.pallas import tpu as pltpu


def _copy_kernel(x_ref, o_ref):
    # Identically-shaped blocks in VMEM: pure copy, no relayout.
    o_ref[...] = x_ref[...]


def _tile_size(dim, align, cap):
    """Largest `align`-multiple tile <= min(dim, cap); full dim if dim <= align."""
    if dim <= align:
        return dim  # full-dim block is always a legal layout
    t = min(dim, max(cap, align))
    return max(align, (t // align) * align)


def _device_kind():
    try:
        return jax.devices()[0].device_kind.lower()
    except Exception:
        return ""


def _flat_2d_shape(B, F, sub_align):
    """Pick a lane-/sublane-dense 2D view of the flat contiguous buffer."""
    # Fast path: the logical (B, F) layout is already lane- and sublane-dense.
    if F >= 128 and F % 128 == 0 and B >= sub_align:
        return B, F, False
    N = B * F
    if N % 128 != 0:
        # Cannot retile densely; keep (B, F) (edge blocks masked, still correct).
        return B, F, False
    # Largest 128*2^k lane width (<= 2048) that keeps >= sub_align rows.
    L = 128
    while N % (L * 2) == 0 and L * 2 <= 2048 and N // (L * 2) >= sub_align:
        L *= 2
    return N // L, L, True


def flatten(x, *, materialize=True, target_block_bytes=None):
    """Pallas TPU Flatten: (B, ...) -> (B, prod(...)).

    materialize=False is the recommended production path: for a contiguous
    array the flatten is metadata-only (no kernel, no HBM round-trip).
    materialize=True routes the data through a lane-dense Pallas block copy
    (use when an explicit fresh buffer is required).
    """
    B = x.shape[0]
    F = 1
    for d in x.shape[1:]:
        F *= d

    # Metadata-only in XLA for a contiguous array (matches torch .view(B, -1)).
    x_flat = jnp.reshape(x, (B, F))
    if not materialize or B == 0 or F == 0:
        return x_flat

    itemsize = jnp.dtype(x.dtype).itemsize
    # Sublane packing: 8 rows for 32-bit, 16 for 16-bit, 32 for 8-bit dtypes.
    sub_align = max(8, 32 // max(itemsize, 1))
    lane_align = 128

    # Generation-aware sizing.
    is_v7 = "v7" in _device_kind()
    if target_block_bytes is None:
        target_block_bytes = (8 if is_v7 else 4) * 1024 * 1024
    vmem_limit_bytes = (48 if is_v7 else 32) * 1024 * 1024

    # Retile over the flat contiguous buffer when the logical (B, F) shape is
    # not lane-dense or is sublane-poor; the retile reshape is metadata-only.
    R, L, retiled = _flat_2d_shape(B, F, sub_align)
    buf = jnp.reshape(x_flat, (R, L)) if retiled else x_flat

    # Lane tile: multiple of 128 (lane-dense, unmasked vst), capped by budget.
    lane_cap = max(
        lane_align,
        (target_block_bytes // (sub_align * itemsize)) // lane_align * lane_align,
    )
    TF = _tile_size(L, lane_align, lane_cap)
    # Row tile: multiple of the sublane packing, within the per-block budget.
    row_cap = max(sub_align, target_block_bytes // (TF * itemsize))
    TB = _tile_size(R, sub_align, row_cap)

    # v7x megacore: guarantee >= 2 parallel grid steps for mid-size tensors so
    # both TensorCores share the copy bandwidth.
    total_bytes = B * F * itemsize
    if is_v7 and total_bytes > (2 << 20) and pl.cdiv(R, TB) * pl.cdiv(L, TF) < 2:
        if R > sub_align:
            TB = max(sub_align, (pl.cdiv(R, 2) // sub_align) * sub_align)
        elif L > lane_align:
            TF = max(lane_align, (pl.cdiv(L, 2) // lane_align) * lane_align)

    grid = (pl.cdiv(R, TB), pl.cdiv(L, TF))

    out = pl.pallas_call(
        _copy_kernel,
        out_shape=jax.ShapeDtypeStruct((R, L), x.dtype),
        grid_spec=pltpu.PrefetchScalarGridSpec(
            num_scalar_prefetch=0,
            grid=grid,
            in_specs=[pl.BlockSpec((TB, TF), lambda i, j: (i, j))],
            out_specs=pl.BlockSpec((TB, TF), lambda i, j: (i, j)),
        ),
        compiler_params=pltpu.CompilerParams(
            # Both axes independent -> megacore-shardable on v7x.
            dimension_semantics=("parallel", "parallel"),
            # Double-buffered 2*(in+out) blocks fit comfortably under the limit
            # on v5e/v6e (128 MiB physical) and v7x (64 MiB physical).
            vmem_limit_bytes=vmem_limit_bytes,
        ),
        # Pure memory-bound custom call: help XLA schedule/overlap around it.
        cost_estimate=pl.CostEstimate(
            flops=0, transcendentals=0, bytes_accessed=2 * B * F * itemsize
        ),
        # NOTE: input_output_aliases={0: 0} would let the output reuse a donated
        # input HBM buffer (saves the allocation, not the copy traffic); omitted
        # so callers may keep using `x`.
    )(buf)

    return jnp.reshape(out, (B, F)) if retiled else out


if __name__ == "__main__":
    key = jax.random.PRNGKey(0)
    # Small conv-like output: batch=2, channels=4, spatial=16x16.
    x = jax.random.normal(key, (2, 4, 16, 16), dtype=jnp.float32)

    out = jax.block_until_ready(flatten(x))
    ref = x.reshape(x.shape[0], -1)
    assert out.shape == ref.shape, (out.shape, ref.shape)
    assert out.dtype == ref.dtype
    assert jnp.array_equal(out, ref), "Pallas flatten mismatch (retiled path)"

    # Zero-cost production path (metadata-only reshape, no kernel launched).
    out_meta = jax.block_until_ready(flatten(x, materialize=False))
    assert jnp.array_equal(out_meta, ref)

    # Ragged, non-128-divisible fallback path (masked edge blocks).
    x2 = jax.random.normal(key, (3, 5, 7), dtype=jnp.float32)
    out2 = jax.block_until_ready(flatten(x2))
    assert jnp.array_equal(out2, x2.reshape(3, -1)), "Pallas flatten mismatch (fallback)"

    # Packed-dtype path (bf16, sublane packing = 16 -> (16, 128) retile).
    x3 = jax.random.normal(key, (2, 4, 16, 16), dtype=jnp.bfloat16)
    out3 = jax.block_until_ready(flatten(x3))
    assert jnp.array_equal(out3, x3.reshape(2, -1)), "Pallas flatten mismatch (bf16)"

    print("KERNEL_OK")
</pallas_src>

<mosaic_0001>
module attributes {stable_mosaic.version = 11 : i64} {
  func.func @_copy_kernel(%arg0: i32, %arg1: i32, %arg2: memref<8x256xf32, #tpu.memory_space<vmem>>, %arg3: memref<8x256xf32, #tpu.memory_space<vmem>>) attributes {dimension_semantics = [#tpu.dimension_semantics<parallel>, #tpu.dimension_semantics<parallel>], iteration_bounds = array<i64: 1, 1>, scalar_prefetch = 0 : i64, scratch_operands = 0 : i64, tpu.core_type = #tpu.core_type<tc>, window_params = [{transform_indices = @transform_0, window_bounds = array<i64: 8, 256>}, {transform_indices = @transform_1, window_bounds = array<i64: 8, 256>}]} {
    %c0 = arith.constant 0 : index
    %c0_0 = arith.constant 0 : index
    %0 = vector.load %arg2[%c0, %c0_0] : memref<8x256xf32, #tpu.memory_space<vmem>>, vector<8x256xf32>
    %c0_1 = arith.constant 0 : index
    %c0_2 = arith.constant 0 : index
    %1 = vector.load %arg3[%c0_1, %c0_2] : memref<8x256xf32, #tpu.memory_space<vmem>>, vector<8x256xf32>
    tpu.vector_store %arg3[%c0_1, %c0_2], %0 {strides = array<i32>} : memref<8x256xf32, #tpu.memory_space<vmem>>, vector<8x256xf32>,
    return
  }
  func.func @transform_0(%arg0: i32, %arg1: i32) -> (i32, i32) {
    %c0_i32 = arith.constant 0 : i32
    return %arg0, %arg1 : i32, i32
  }
  func.func @transform_1(%arg0: i32, %arg1: i32) -> (i32, i32) {
    %c0_i32 = arith.constant 0 : i32
    return %arg0, %arg1 : i32, i32
  }
}

</mosaic_0001>

<bundles_post_ra>
// kernel: tpu_custom_call.1
= control target key start
LH: loop header
LB: loop body
LE: loop exit
PB: predicated region body
PF: predicated region fallthrough
CT: control target
= control target key end

     0   :  { %6 = vsyncpa [#allocation3], 0  ;;  %s116_s0 = inlined_call_operand.hbm [shape: f32[8,256], index: 0, kind: input, shape index: {}]   ;;  %s117_s1 = inlined_call_operand.hbm [shape: f32[8,256], index: 1, kind: output, shape index: {}]  }
   0x1   :  { %7 = vsyncpa [#allocation4], 0  ;;  %s13_s8 = sshll.u32 %s116_s0, 4  ;;  %s98_s9 = smov [#allocation2]   ;;  %s14_s8 = int_to_ptr.hbm [resolvable:$true] %s13_s8 }
   0x2   :  { %s15_s10 = sshll.u32 %s98_s9, 4  ;;  %s16_s10 = int_to_ptr.vmem [resolvable:$true] %s15_s10 }
   0x3   :  { %18 = dma.hbm_to_vmem [thread:$0]  %s14_s8, 256, %s16_s10, [#allocation3]  }
   0x4   :  { %94 = dma.done.wait [#allocation3], 256  }
   0x5   :  { %95 = vsyncadd [#allocation3], 4294967040  ;;  %s99_s11 = smov [#allocation5]   ;;  %s34_s15 = sshll.u32 %s117_s1, 4  ;;  %v23_v0 = vld [vmem:[#allocation2] sm:$0xff]  ;;  %v24_v1 = vld [vmem:[#allocation2 + $0x8] sm:$0xff]  ;;  %s35_s15 = int_to_ptr.hbm [resolvable:$true] %s34_s15 }
   0x6   :  { %s32_s12 = sshll.u32 %s99_s11, 4  ;;  %25 = vst [vmem:[#allocation5] sm:$0xff] %v23_v0  ;;  %s33_s12 = int_to_ptr.vmem [resolvable:$true] %s32_s12 }
   0x7   :  { %26 = vst [vmem:[#allocation5 + $0x8] sm:$0xff] %v24_v1 }
   0x8   :  { %37 = dma.vmem_to_hbm [thread:$0]  %s33_s12, 256, %s35_s15, [#allocation4]  }
   0x9   :  { %96 = dma.done.wait [#allocation4], 256  }
   0xa   :  { %97 = vsyncadd [#allocation4], 4294967040 }
   0xb   :  { %42 = vsyncpa [#allocation3], 1 }
   0xc   :  { %43 = vsyncpa [#allocation4], 1 }

</bundles_post_ra>
